<compile_context>
chip_gen: v5e
topology: v5e:2x2
jax: 0.10.0
libtpu: 0.0.40
codegen_flags: <defaults>
</compile_context>

<pallas_src>
import functools

import jax
import jax.numpy as jnp
from jax.experimental import pallas as pl
from jax.experimental.pallas import tpu as pltpu


# ----------------------------- Pallas kernel ------------------------------- #

def _textcnn_kernel(filter_sizes, num_filters,
                    emb_ref, wcat_ref, bcat_ref, fcw_ref, fcb_ref, out_ref):
    """Everything after the embedding gather (convs, relu, max-pool, fc)."""
    nf = num_filters
    tB, two, L, E = emb_ref.shape          # [tile_B, 2(text/entity), L, E]
    Fp = wcat_ref.shape[1]                 # lane-padded packed conv-weight width (128)

    # ONE flat MXU matmul covers both embeddings, every filter width and offset:
    #   p[row, base_k + j*nf + f] = sum_e emb[row, e] * W_k[f, 0, j, e]
    emb2d = emb_ref[...].reshape(tB * two * L, E)
    p = jnp.dot(emb2d, wcat_ref[...], preferred_element_type=jnp.float32)
    p = p.reshape(tB, two, L, Fp)          # lane-dense intermediate

    # Conv outputs via shifted sublane sums of column slices, then global max-pool.
    pooled = []
    base = 0
    for k in filter_sizes:
        T = L - k + 1
        acc = p[:, :, 0:T, base:base + nf]
        for j in range(1, k):
            acc = acc + p[:, :, j:j + T, base + j * nf: base + (j + 1) * nf]
        pooled.append(jnp.max(acc, axis=2))              # [tB, 2, nf]
        base += k * nf
    pooled = jnp.concatenate(pooled, axis=2)             # [tB, 2, 3*nf]

    # Bias + ReLU hoisted after the pool (exact: bias is t-invariant, relu monotone).
    feat = jnp.maximum(pooled + bcat_ref[...][None, :, :], 0.0)

    # TODO(synk): dropout is identity here (eval-mode semantics; no RNG mask applied).

    # Final linear layer split into text / entity halves (row slices, no lane concat):
    #   logits = fc_b + text_feat @ fc_w[:3nf] + entity_feat @ fc_w[3nf:]
    logits = (fcb_ref[...]
              + jnp.dot(feat[:, 0, :], fcw_ref[0], preferred_element_type=jnp.float32)
              + jnp.dot(feat[:, 1, :], fcw_ref[1], preferred_element_type=jnp.float32))
    out_ref[...] = logits.astype(out_ref.dtype)


def textcnn_forward(emb_a, emb_b, conv_ws, conv_bs, fc_w, fc_b,
                    filter_sizes, num_filters, num_classes, batch_tile=None):
    B, L, E = emb_a.shape
    nf = num_filters
    F = sum(filter_sizes) * nf
    Fp = ((F + 127) // 128) * 128                       # lane-pad packed width to 128

    if batch_tile is None:
        batch_tile = B                                  # toy shapes: single grid step
    assert B % batch_tile == 0
    grid = (B // batch_tile,)

    # Stack text/entity so one conv matmul and one pooling pass cover both.
    emb = jnp.stack([emb_a, emb_b], axis=1)             # [B, 2, L, E]

    # Pack all (filter, offset) weight slices into one [E, Fp] matrix (zero-padded).
    w_slices = []
    for k, w in zip(filter_sizes, conv_ws):
        for j in range(k):
            w_slices.append(w[j * E:(j + 1) * E, :])    # [E, nf] slice for offset j
    w_cat = jnp.concatenate(w_slices, axis=1)           # [E, F]
    w_cat = jnp.pad(w_cat, ((0, 0), (0, Fp - F)))       # [E, Fp] lane-dense

    # Conv biases (shared by text & entity since they are applied on the stacked axis).
    b_cat = jnp.concatenate(list(conv_bs), axis=1)      # [1, 3*nf]

    # Final linear weights split into text / entity halves: [2, 3*nf, C].
    fcw = fc_w.reshape(2, len(filter_sizes) * nf, num_classes)

    kernel = functools.partial(_textcnn_kernel, tuple(filter_sizes), num_filters)

    # Advisory cost estimate for the XLA scheduler.
    flops = 2 * (2 * B * L) * E * Fp + 2 * 2 * B * (len(filter_sizes) * nf) * num_classes
    bytes_accessed = 4 * (emb.size + w_cat.size + b_cat.size + fcw.size + fc_b.size
                          + B * num_classes)

    return pl.pallas_call(
        kernel,
        out_shape=jax.ShapeDtypeStruct((B, num_classes), jnp.float32),
        grid_spec=pltpu.PrefetchScalarGridSpec(
            num_scalar_prefetch=0,
            grid=grid,
            in_specs=[
                pl.BlockSpec((batch_tile, 2, L, E), lambda b: (b, 0, 0, 0)),
                pl.BlockSpec((E, Fp), lambda b: (0, 0)),
                pl.BlockSpec((1, len(filter_sizes) * nf), lambda b: (0, 0)),
                pl.BlockSpec((2, len(filter_sizes) * nf, num_classes),
                             lambda b: (0, 0, 0)),
                pl.BlockSpec((1, num_classes), lambda b: (0, 0)),
            ],
            out_specs=pl.BlockSpec((batch_tile, num_classes), lambda b: (b, 0)),
        ),
        compiler_params=pltpu.CompilerParams(
            dimension_semantics=("parallel",)),
        cost_estimate=pl.CostEstimate(flops=flops, transcendentals=0,
                                      bytes_accessed=bytes_accessed),
    )(emb, w_cat, b_cat, fcw, fc_b)


# ----------------------------- pure-JAX reference --------------------------- #

def reference_forward(emb_a, emb_b, conv_ws, conv_bs, fc_w, fc_b, filter_sizes):
    def conv_pool(emb, w, b, k):
        B, L, E = emb.shape
        outs = []
        for t in range(L - k + 1):
            win = emb[:, t:t + k, :].reshape(B, k * E)
            outs.append(win @ w + b)            # [B, nf]
        s = jnp.stack(outs, axis=1)             # [B, T, nf]
        return jnp.max(jax.nn.relu(s), axis=1)  # [B, nf]

    feats = []
    for emb in (emb_a, emb_b):
        for k, w, b in zip(filter_sizes, conv_ws, conv_bs):
            feats.append(conv_pool(emb, w, b[0], k))
    cat = jnp.concatenate(feats, axis=1)
    return cat @ fc_w + fc_b[0]


# ----------------------------------- main ----------------------------------- #

if __name__ == "__main__":
    # Small config consistent with the module.
    n_vocab = 16
    embed = 32
    seq_len = 8
    batch = 2
    num_filters = 8
    filter_sizes = (2, 3, 4)
    num_classes = 4

    key = jax.random.PRNGKey(0)
    keys = jax.random.split(key, 16)

    # Deterministic parameters.
    emb_table = jax.random.normal(keys[0], (n_vocab, embed), jnp.float32) * 0.1
    emb_table = emb_table.at[n_vocab - 1].set(0.0)   # padding_idx row zeroed

    conv_ws, conv_bs = [], []
    for i, k in enumerate(filter_sizes):
        conv_ws.append(jax.random.normal(keys[1 + i], (k * embed, num_filters),
                                         jnp.float32) * 0.1)
        conv_bs.append(jax.random.normal(keys[5 + i], (1, num_filters),
                                         jnp.float32) * 0.1)

    fc_in = num_filters * len(filter_sizes) * 2
    fc_w = jax.random.normal(keys[10], (fc_in, num_classes), jnp.float32) * 0.1
    fc_b = jax.random.normal(keys[11], (1, num_classes), jnp.float32) * 0.1

    # Inputs: x = (text_tokens, entity_tokens), both [B, L] int32.
    tok_a = jax.random.randint(keys[12], (batch, seq_len), 0, n_vocab, jnp.int32)
    tok_b = jax.random.randint(keys[13], (batch, seq_len), 0, n_vocab, jnp.int32)

    # Embedding gather is glue; done in plain JAX (row gather).
    emb_a = jnp.take(emb_table, tok_a, axis=0)       # [B, L, E]
    emb_b = jnp.take(emb_table, tok_b, axis=0)       # [B, L, E]

    out = textcnn_forward(emb_a, emb_b, conv_ws, conv_bs, fc_w, fc_b,
                          filter_sizes, num_filters, num_classes)
    out = jax.block_until_ready(out)

    ref = jax.block_until_ready(
        reference_forward(emb_a, emb_b, conv_ws, conv_bs, fc_w, fc_b, filter_sizes))

    assert out.shape == (batch, num_classes)
    assert jnp.allclose(out, ref, atol=1e-5, rtol=1e-5), (out, ref)
    print("KERNEL_OK")
</pallas_src>

<mosaic_0001>
module attributes {stable_mosaic.version = 11 : i64} {
  func.func @_textcnn_kernel(%arg0: i32, %arg1: memref<2x2x8x32xf32, #tpu.memory_space<vmem>>, %arg2: memref<32x128xf32, #tpu.memory_space<vmem>>, %arg3: memref<1x24xf32, #tpu.memory_space<vmem>>, %arg4: memref<2x24x4xf32, #tpu.memory_space<vmem>>, %arg5: memref<1x4xf32, #tpu.memory_space<vmem>>, %arg6: memref<2x4xf32, #tpu.memory_space<vmem>>) attributes {dimension_semantics = [#tpu.dimension_semantics<parallel>], iteration_bounds = array<i64: 1>, scalar_prefetch = 0 : i64, scratch_operands = 0 : i64, tpu.core_type = #tpu.core_type<tc>, window_params = [{transform_indices = @transform_0, window_bounds = array<i64: 2, 2, 8, 32>}, {pipeline_mode = #tpu.pipeline_mode<synchronous>, transform_indices = @transform_1, window_bounds = array<i64: 32, 128>}, {pipeline_mode = #tpu.pipeline_mode<synchronous>, transform_indices = @transform_2, window_bounds = array<i64: 1, 24>}, {pipeline_mode = #tpu.pipeline_mode<synchronous>, transform_indices = @transform_3, window_bounds = array<i64: 2, 24, 4>}, {pipeline_mode = #tpu.pipeline_mode<synchronous>, transform_indices = @transform_4, window_bounds = array<i64: 1, 4>}, {transform_indices = @transform_5, window_bounds = array<i64: 2, 4>}]} {
    %c0 = arith.constant 0 : index
    %c0_0 = arith.constant 0 : index
    %c0_1 = arith.constant 0 : index
    %c0_2 = arith.constant 0 : index
    %0 = vector.load %arg1[%c0, %c0_0, %c0_1, %c0_2] : memref<2x2x8x32xf32, #tpu.memory_space<vmem>>, vector<2x2x8x32xf32>
    %1 = vector.shape_cast %0 : vector<2x2x8x32xf32> to vector<32x32xf32>
    %c0_3 = arith.constant 0 : index
    %c0_4 = arith.constant 0 : index
    %2 = vector.load %arg2[%c0_3, %c0_4] : memref<32x128xf32, #tpu.memory_space<vmem>>, vector<32x128xf32>
    %cst = arith.constant dense<0.000000e+00> : vector<32x128xf32>
    %3 = tpu.matmul %1, %2, %cst {dimension_numbers = #tpu.dot_dimension_numbers<[1], [0], [0], [1], [0, 0, 1, 1], [], []>} : vector<32x32xf32>, vector<32x128xf32>, vector<32x128xf32> -> vector<32x128xf32>
    %4 = vector.shape_cast %3 : vector<32x128xf32> to vector<2x2x8x128xf32>
    %5 = vector.extract_strided_slice %4 {offsets = [0, 0, 0, 0], sizes = [2, 2, 7, 8], strides = [1, 1, 1, 1]} : vector<2x2x8x128xf32> to vector<2x2x7x8xf32>
    %6 = vector.extract_strided_slice %4 {offsets = [0, 0, 1, 8], sizes = [2, 2, 7, 8], strides = [1, 1, 1, 1]} : vector<2x2x8x128xf32> to vector<2x2x7x8xf32>
    %7 = arith.addf %5, %6 : vector<2x2x7x8xf32>
    %cst_5 = arith.constant dense<0xFF800000> : vector<2x2x8xf32>
    %8 = vector.multi_reduction <maximumf>, %7, %cst_5 [2] : vector<2x2x7x8xf32> to vector<2x2x8xf32>
    %9 = vector.extract_strided_slice %4 {offsets = [0, 0, 0, 16], sizes = [2, 2, 6, 8], strides = [1, 1, 1, 1]} : vector<2x2x8x128xf32> to vector<2x2x6x8xf32>
    %10 = vector.extract_strided_slice %4 {offsets = [0, 0, 1, 24], sizes = [2, 2, 6, 8], strides = [1, 1, 1, 1]} : vector<2x2x8x128xf32> to vector<2x2x6x8xf32>
    %11 = arith.addf %9, %10 : vector<2x2x6x8xf32>
    %12 = vector.extract_strided_slice %4 {offsets = [0, 0, 2, 32], sizes = [2, 2, 6, 8], strides = [1, 1, 1, 1]} : vector<2x2x8x128xf32> to vector<2x2x6x8xf32>
    %13 = arith.addf %11, %12 : vector<2x2x6x8xf32>
    %cst_6 = arith.constant dense<0xFF800000> : vector<2x2x8xf32>
    %14 = vector.multi_reduction <maximumf>, %13, %cst_6 [2] : vector<2x2x6x8xf32> to vector<2x2x8xf32>
    %15 = vector.extract_strided_slice %4 {offsets = [0, 0, 0, 40], sizes = [2, 2, 5, 8], strides = [1, 1, 1, 1]} : vector<2x2x8x128xf32> to vector<2x2x5x8xf32>
    %16 = vector.extract_strided_slice %4 {offsets = [0, 0, 1, 48], sizes = [2, 2, 5, 8], strides = [1, 1, 1, 1]} : vector<2x2x8x128xf32> to vector<2x2x5x8xf32>
    %17 = arith.addf %15, %16 : vector<2x2x5x8xf32>
    %18 = vector.extract_strided_slice %4 {offsets = [0, 0, 2, 56], sizes = [2, 2, 5, 8], strides = [1, 1, 1, 1]} : vector<2x2x8x128xf32> to vector<2x2x5x8xf32>
    %19 = arith.addf %17, %18 : vector<2x2x5x8xf32>
    %20 = vector.extract_strided_slice %4 {offsets = [0, 0, 3, 64], sizes = [2, 2, 5, 8], strides = [1, 1, 1, 1]} : vector<2x2x8x128xf32> to vector<2x2x5x8xf32>
    %21 = arith.addf %19, %20 : vector<2x2x5x8xf32>
    %cst_7 = arith.constant dense<0xFF800000> : vector<2x2x8xf32>
    %22 = vector.multi_reduction <maximumf>, %21, %cst_7 [2] : vector<2x2x5x8xf32> to vector<2x2x8xf32>
    %23 = tpu.concatenate %8, %14, %22 in 2 : vector<2x2x8xf32>, vector<2x2x8xf32>, vector<2x2x8xf32> -> vector<2x2x24xf32>
    %c0_8 = arith.constant 0 : index
    %c0_9 = arith.constant 0 : index
    %24 = vector.load %arg3[%c0_8, %c0_9] : memref<1x24xf32, #tpu.memory_space<vmem>>, vector<1x24xf32>
    %25 = vector.shape_cast %24 : vector<1x24xf32> to vector<1x1x24xf32>
    %26 = vector.broadcast %25 : vector<1x1x24xf32> to vector<2x2x24xf32>
    %27 = arith.addf %23, %26 : vector<2x2x24xf32>
    %cst_10 = arith.constant 0.000000e+00 : f32
    %28 = vector.broadcast %cst_10 : f32 to vector<2x2x24xf32>
    %29 = arith.maximumf %27, %28 : vector<2x2x24xf32>
    %c0_11 = arith.constant 0 : index
    %c0_12 = arith.constant 0 : index
    %30 = vector.load %arg5[%c0_11, %c0_12] : memref<1x4xf32, #tpu.memory_space<vmem>>, vector<1x4xf32>
    %31 = vector.extract_strided_slice %29 {offsets = [0, 0, 0], sizes = [2, 1, 24], strides = [1, 1, 1]} : vector<2x2x24xf32> to vector<2x1x24xf32>
    %32 = vector.shape_cast %31 : vector<2x1x24xf32> to vector<2x24xf32>
    %c0_13 = arith.constant 0 : index
    %c0_14 = arith.constant 0 : index
    %c0_15 = arith.constant 0 : index
    %33 = vector.load %arg4[%c0_13, %c0_14, %c0_15] : memref<2x24x4xf32, #tpu.memory_space<vmem>>, vector<1x24x4xf32>
    %34 = vector.shape_cast %33 : vector<1x24x4xf32> to vector<24x4xf32>
    %cst_16 = arith.constant dense<0.000000e+00> : vector<2x4xf32>
    %35 = tpu.matmul %32, %34, %cst_16 {dimension_numbers = #tpu.dot_dimension_numbers<[1], [0], [0], [1], [0, 0, 1, 1], [], []>} : vector<2x24xf32>, vector<24x4xf32>, vector<2x4xf32> -> vector<2x4xf32>
    %36 = vector.broadcast %30 : vector<1x4xf32> to vector<2x4xf32>
    %37 = arith.addf %36, %35 : vector<2x4xf32>
    %38 = vector.extract_strided_slice %29 {offsets = [0, 1, 0], sizes = [2, 1, 24], strides = [1, 1, 1]} : vector<2x2x24xf32> to vector<2x1x24xf32>
    %39 = vector.shape_cast %38 : vector<2x1x24xf32> to vector<2x24xf32>
    %c1 = arith.constant 1 : index
    %c0_17 = arith.constant 0 : index
    %c0_18 = arith.constant 0 : index
    %40 = vector.load %arg4[%c1, %c0_17, %c0_18] : memref<2x24x4xf32, #tpu.memory_space<vmem>>, vector<1x24x4xf32>
    %41 = vector.shape_cast %40 : vector<1x24x4xf32> to vector<24x4xf32>
    %cst_19 = arith.constant dense<0.000000e+00> : vector<2x4xf32>
    %42 = tpu.matmul %39, %41, %cst_19 {dimension_numbers = #tpu.dot_dimension_numbers<[1], [0], [0], [1], [0, 0, 1, 1], [], []>} : vector<2x24xf32>, vector<24x4xf32>, vector<2x4xf32> -> vector<2x4xf32>
    %43 = arith.addf %37, %42 : vector<2x4xf32>
    %c0_20 = arith.constant 0 : index
    %c0_21 = arith.constant 0 : index
    %44 = vector.load %arg6[%c0_20, %c0_21] : memref<2x4xf32, #tpu.memory_space<vmem>>, vector<2x4xf32>
    tpu.vector_store %arg6[%c0_20, %c0_21], %43 {strides = array<i32>} : memref<2x4xf32, #tpu.memory_space<vmem>>, vector<2x4xf32>,
    return
  }
  func.func @transform_0(%arg0: i32) -> (i32, i32, i32, i32) {
    %c0_i32 = arith.constant 0 : i32
    %c0_i32_0 = arith.constant 0 : i32
    %c0_i32_1 = arith.constant 0 : i32
    %c0_i32_2 = arith.constant 0 : i32
    return %arg0, %c0_i32, %c0_i32_0, %c0_i32_1 : i32, i32, i32, i32
  }
  func.func @transform_1(%arg0: i32) -> (i32, i32) {
    %c0_i32 = arith.constant 0 : i32
    %c0_i32_0 = arith.constant 0 : i32
    %c0_i32_1 = arith.constant 0 : i32
    return %c0_i32, %c0_i32_0 : i32, i32
  }
  func.func @transform_2(%arg0: i32) -> (i32, i32) {
    %c0_i32 = arith.constant 0 : i32
    %c0_i32_0 = arith.constant 0 : i32
    %c0_i32_1 = arith.constant 0 : i32
    return %c0_i32, %c0_i32_0 : i32, i32
  }
  func.func @transform_3(%arg0: i32) -> (i32, i32, i32) {
    %c0_i32 = arith.constant 0 : i32
    %c0_i32_0 = arith.constant 0 : i32
    %c0_i32_1 = arith.constant 0 : i32
    %c0_i32_2 = arith.constant 0 : i32
    return %c0_i32, %c0_i32_0, %c0_i32_1 : i32, i32, i32
  }
  func.func @transform_4(%arg0: i32) -> (i32, i32) {
    %c0_i32 = arith.constant 0 : i32
    %c0_i32_0 = arith.constant 0 : i32
    %c0_i32_1 = arith.constant 0 : i32
    return %c0_i32, %c0_i32_0 : i32, i32
  }
  func.func @transform_5(%arg0: i32) -> (i32, i32) {
    %c0_i32 = arith.constant 0 : i32
    %c0_i32_0 = arith.constant 0 : i32
    return %arg0, %c0_i32 : i32, i32
  }
}

</mosaic_0001>

<bundles_post_ra>
// kernel: tpu_custom_call.1
= control target key start
LH: loop header
LB: loop body
LE: loop exit
PB: predicated region body
PF: predicated region fallthrough
CT: control target
= control target key end

     0   :  { %10 = vsyncpa [#allocation3], 0  ;;  %s557_s0 = inlined_call_operand.vmem [shape: f32[2,2,8,32], index: 0, kind: input, shape index: {}]   ;;  %s558_s1 = inlined_call_operand.hbm [shape: f32[32,128], index: 1, kind: input, shape index: {}]   ;;  %s559_s2 = inlined_call_operand.vmem [shape: f32[1,24], index: 2, kind: input, shape index: {}]   ;;  %s560_s3 = inlined_call_operand.vmem [shape: f32[2,24,4], index: 3, kind: input, shape index: {}]   ;;  %s561_s4 = inlined_call_operand.vmem [shape: f32[1,4], index: 4, kind: input, shape index: {}]   ;;  %s562_s5 = inlined_call_operand.hbm [shape: f32[2,4], index: 5, kind: output, shape index: {}]  }
   0x1   :  { %11 = vsyncpa [#allocation4], 0  ;;  %s18_s20 = sshll.u32 %s558_s1, 4  ;;  %s442_s21 = smov [#allocation2]   ;;  %s19_s20 = int_to_ptr.hbm [resolvable:$true] %s18_s20 }
   0x2   :  { %s20_s22 = sshll.u32 %s442_s21, 4  ;;  %s443_s23 = smov 128   ;;  %s21_s22 = int_to_ptr.vmem [resolvable:$true] %s20_s22 }
   0x3   :  { %s444_s24 = smov 8  }
   0x4   :  { %26 = dma.hbm_to_vmem [thread:$0]  %s19_s20, 512, %s21_s22, [#allocation3], %s443_s23, %s443_s23, %s444_s24  }
   0x5   :  { %438 = dma.done.wait [#allocation3], 512  }
   0x6   :  { %439 = vsyncadd [#allocation3], 4294966784  ;;  %v44_v0 = vld [vmem:[#allocation2 + $0x18] sm:$0xff]  ;;  %v43_v1 = vld [vmem:[#allocation2 + $0x10] sm:$0xff]  ;;  %vm45_vm0 = vcmask 261120   ;;  %s445_s7 = smov 112  }
   0x7   :  { %70 = vmatpush.msra.mxu0 %v44_v0  ;;  %377 = vmatpush.msra.mxu3 %v44_v0  ;;  %v42_v2 = vld [vmem:[#allocation2 + $0x8] sm:$0xff]  ;;  %v41_v3 = vld [vmem:[#allocation2] sm:$0xff]  ;;  %v39_v5 = vld [vmem:[%s557_s0 + $0x10] sm:$0xff]  ;;  %s446_s8 = smov 120   ;;  %s447_s9 = smov 104   ;;  %vm111_vm1 = vcmask 63488  }
   0x8   :  { %v37_v4 = vld [vmem:[%s557_s0] sm:$0xff]  ;;  %v40_v6 = vld [vmem:[%s557_s0 + $0x18] sm:$0xff]  ;;  %v38_v7 = vld [vmem:[%s557_s0 + $0x8] sm:$0xff]  ;;  %vm160_vm2 = vcmask 193664   ;;  %vm209_vm3 = vcmask 389440   ;;  %vm242_vm4 = vcmask 1041409  }
   0x9   :  { %71 = vmatpush.msra.mxu0 %v43_v1  ;;  %378 = vmatpush.msra.mxu3 %v43_v1  ;;  %vm274_vm5 = vcmask 130048   ;;  %vm271_vm6 = vcmask 64512   ;;  %vm293_vm7 = vcmask 195584   ;;  %s448_s23 = smov [#allocation5]   ;;  %s358_s26 = sshll.u32 %s562_s5, 4  ;;  %vm349_vm8 = vcmask 25600   ;;  %s359_s26 = int_to_ptr.hbm [resolvable:$true] %s358_s26 }
   0xa   :  { %s356_s24 = sshll.u32 %s448_s23, 4  ;;  %s357_s24 = int_to_ptr.vmem [resolvable:$true] %s356_s24 }
   0xb   :  { %72 = vmatpush.msra.mxu0 %v42_v2  ;;  %379 = vmatpush.msra.mxu3 %v42_v2 }
   0xd   :  { %73 = vmatpush.msra.mxu0 %v41_v3  ;;  %380 = vmatpush.msra.mxu3 %v41_v3 }
   0xe   :  { %368 = vmatmul.msk.f32.vlgmr.msra.gmra.mxu0 %vm45_vm0, %v37_v4  ;;  %370 = vmatmul.msk.f32.vlgmr.msra.gmra.mxu3 %vm45_vm0, %v39_v5 }
  0x16   :  { %371 = vmatmul.msk.f32.gmra.mxu3 %vm45_vm0, %v40_v6  ;;  %369 = vmatmul.msk.f32.gmra.mxu0 %vm45_vm0, %v38_v7 }
  0x8b   :  { %v75_v8 = vpop.f32.mrf.mxu0 }
  0x8c   :  { %v140_v9 = vrot.slane %v75_v8, 2  ;;  %v91_v10 = vrot.slane %v75_v8, 1  ;;  %v189_v13 = vrot.slane %v75_v8, 3 }
  0x8e   :  { %144 = vrot.lane.b32.xlu2 %v140_v9, %s445_s7  ;;  %95 = vrot.lane.b32.xlu0 %v91_v10, %s446_s8 }
  0x91   :  { %v81_v11 = vpop.f32.mrf.mxu3 }
  0x92   :  { %v93_v12 = vrot.slane %v81_v11, 1  ;;  %v142_v14 = vrot.slane %v81_v11, 2  ;;  %v191_v23 = vrot.slane %v81_v11, 3 }
  0x93   :  { %v78_v15 = vpop.f32.mrf.mxu0 }
  0x94   :  { %99 = vrot.lane.b32.xlu1 %v93_v12, %s446_s8  ;;  %v92_v18 = vrot.slane %v78_v15, 1  ;;  %v141_v19 = vrot.slane %v78_v15, 2  ;;  %v190_v22 = vrot.slane %v78_v15, 3 }
  0x96   :  { %193 = vrot.lane.b32.xlu2 %v189_v13, %s447_s9  ;;  %148 = vrot.lane.b32.xlu0 %v142_v14, %s445_s7 }
  0x99   :  { %v84_v16 = vpop.f32.mrf.mxu3 }
  0x9a   :  { %v94_v17 = vrot.slane %v84_v16, 1  ;;  %v143_v20 = vrot.slane %v84_v16, 2  ;;  %v192_v21 = vrot.slane %v84_v16, 3 }
  0x9c   :  { %101 = vrot.lane.b32.xlu1 %v94_v17, %s446_s8 }
  0x9e   :  { %146 = vrot.lane.b32.xlu2 %v141_v19, %s445_s7  ;;  %97 = vrot.lane.b32.xlu0 %v92_v18, %s446_s8 }
  0xa4   :  { %150 = vrot.lane.b32.xlu1 %v143_v20, %s445_s7 }
  0xa6   :  { %199 = vrot.lane.b32.xlu2 %v192_v21, %s447_s9  ;;  %195 = vrot.lane.b32.xlu0 %v190_v22, %s447_s9 }
  0xac   :  { %197 = vrot.lane.b32.xlu1 %v191_v23, %s447_s9 }
  0xe8   :  { %v145_v24 = vpop.permute.xlu2 %144 }
  0xf0   :  { %v194_v28 = vpop.permute.xlu2 %193 }
  0xf8   :  { %v147_v43 = vpop.permute.xlu2 %146 }
 0x100   :  { %v96_v25 = vpop.permute.xlu0 %95 }
 0x101   :  { %v107_v26 = vadd.f32 %v96_v25, %v75_v8 }
 0x103   :  { %v112_v27 = vsel %vm111_vm1, %v107_v26, -inf  ;;  %v156_v29 = vadd.f32 %v145_v24, %v107_v26 }
 0x104   :  { %v113_v30 = vrot.slane %v112_v27, 4 }
 0x105   :  { %v161_v34 = vsel %vm160_vm2, %v156_v29, -inf  ;;  %v205_v38 = vadd.f32 %v194_v28, %v156_v29 }
 0x106   :  { %v100_v31 = vpop.permute.xlu1 %99  ;;  %v114_v37 = vmax.f32 %v112_v27, %v113_v30  ;;  %v162_v40 = vrot.slane %v161_v34, 4 }
 0x107   :  { %v109_v32 = vadd.f32 %v100_v31, %v81_v11  ;;  %v210_v45 = vsel %vm209_vm3, %v205_v38, -inf  ;;  %v200_v11 = vpop.permute.xlu2 %199 }
 0x108   :  { %v149_v33 = vpop.permute.xlu0 %148  ;;  %v115_v44 = vrot.slane %v114_v37, 2  ;;  %v163_v50 = vmax.f32 %v161_v34, %v162_v40  ;;  %v211_v52 = vrot.slane %v210_v45, 4 }
 0x109   :  { %v126_v35 = vsel %vm111_vm1, %v109_v32, -inf  ;;  %v505_v36 = vadd.f32 %v149_v33, %v109_v32 }
 0x10a   :  { %v127_v39 = vrot.slane %v126_v35, 4  ;;  %v116_v55 = vmax.f32 %v114_v37, %v115_v44  ;;  %v164_v61 = vrot.slane %v163_v50, 2  ;;  %v212_v0 = vmax.f32 %v210_v45, %v211_v52 }
 0x10b   :  { %v175_v42 = vsel %vm160_vm2, %v505_v36, -inf }
 0x10c   :  { %v128_v41 = vmax.f32 %v126_v35, %v127_v39  ;;  %v176_v48 = vrot.slane %v175_v42, 4  ;;  %v117_v6 = vrot.slane %v116_v55, 1  ;;  %v165_v10 = vmax.f32 %v163_v50, %v164_v61 }
 0x10e   :  { %v102_v46 = vpop.permute.xlu1 %101  ;;  %v129_v47 = vrot.slane %v128_v41, 2  ;;  %v177_v58 = vmax.f32 %v175_v42, %v176_v48  ;;  %v118_v32 = vmax.f32 %v116_v55, %v117_v6  ;;  %v166_v35 = vrot.slane %v165_v10, 1 }
 0x10f   :  { %v110_v49 = vadd.f32 %v102_v46, %v84_v16  ;;  %v213_v16 = vrot.slane %v212_v0, 2 }
 0x110   :  { %v98_v51 = vpop.permute.xlu0 %97  ;;  %v130_v57 = vmax.f32 %v128_v41, %v129_v47  ;;  %v178_v8 = vrot.slane %v177_v58, 2  ;;  %v167_v52 = vmax.f32 %v165_v10, %v166_v35  ;;  %v375_v10 = vld [vmem:[%s560_s3 + $0x28] sm:$0xff] }
 0x111   :  { %v133_v53 = vsel %vm111_vm1, %v110_v49, -inf  ;;  %v108_v54 = vadd.f32 %v98_v51, %v78_v15  ;;  %v214_v45 = vmax.f32 %v212_v0, %v213_v16  ;;  %341 = vmatpush.msra.mxu2 %v375_v10 }
 0x112   :  { %v134_v56 = vrot.slane %v133_v53, 4  ;;  %v131_v7 = vrot.slane %v130_v57, 1  ;;  %v179_v25 = vmax.f32 %v177_v58, %v178_v8 }
 0x113   :  { %v119_v59 = vsel %vm111_vm1, %v108_v54, -inf  ;;  %v157_v60 = vadd.f32 %v147_v43, %v108_v54  ;;  %v215_v58 = vrot.slane %v214_v45, 1 }
 0x114   :  { %v135_v62 = vmax.f32 %v133_v53, %v134_v56  ;;  %v120_v63 = vrot.slane %v119_v59, 4  ;;  %v132_v24 = vmax.f32 %v130_v57, %v131_v7  ;;  %v180_v46 = vrot.slane %v179_v25, 1 }
 0x115   :  { %v168_v1 = vsel %vm160_vm2, %v157_v60, -inf }
 0x116   :  { %v136_v2 = vrot.slane %v135_v62, 2  ;;  %v121_v3 = vmax.f32 %v119_v59, %v120_v63  ;;  %v151_v4 = vpop.permute.xlu1 %150  ;;  %v169_v5 = vrot.slane %v168_v1, 4 }
 0x117   :  { %v159_v9 = vadd.f32 %v151_v4, %v110_v49 }
 0x118   :  { %v137_v12 = vmax.f32 %v135_v62, %v136_v2  ;;  %v122_v13 = vrot.slane %v121_v3, 2  ;;  %v170_v14 = vmax.f32 %v168_v1, %v169_v5  ;;  %v196_v15 = vpop.permute.xlu0 %195  ;;  %v216_v1 = vmax.f32 %v214_v45, %v215_v58 }
 0x119   :  { %v182_v17 = vsel %vm160_vm2, %v159_v9, -inf  ;;  %v208_v18 = vadd.f32 %v200_v11, %v159_v9  ;;  %v206_v19 = vadd.f32 %v196_v15, %v157_v60  ;;  %v181_v60 = vmax.f32 %v179_v25, %v180_v46  ;;  %v288_v11 = vld [vmem:[%s560_s3 + $0x10] sm:$0xff]  ;;  %v286_v15 = vld [vmem:[%s560_s3] sm:$0xff] }
 0x11a   :  { %v138_v20 = vrot.slane %v137_v12, 1  ;;  %v123_v21 = vmax.f32 %v121_v3, %v122_v13  ;;  %v183_v22 = vrot.slane %v182_v17, 4  ;;  %v171_v23 = vrot.slane %v170_v14, 2  ;;  %309 = vmatpush.msra.mxu1 %v288_v11  ;;  %v287_v13 = vld [vmem:[%s560_s3 + $0x8] sm:$0xff] }
 0x11b   :  { %v231_v26 = vsel %vm209_vm3, %v208_v18, -inf  ;;  %v217_v27 = vsel %vm209_vm3, %v206_v19, -inf }
 0x11c   :  { %v139_v28 = vmax.f32 %v137_v12, %v138_v20  ;;  %v124_v29 = vrot.slane %v123_v21, 1  ;;  %v184_v30 = vmax.f32 %v182_v17, %v183_v22  ;;  %v232_v31 = vrot.slane %v231_v26, 4  ;;  %v374_v12 = vld [vmem:[%s560_s3 + $0x20] sm:$0xff]  ;;  %310 = vmatpush.msra.mxu1 %v287_v13 }
 0x11d   :  { %v172_v33 = vmax.f32 %v170_v14, %v171_v23  ;;  %v218_v34 = vrot.slane %v217_v27, 4  ;;  %342 = vmatpush.msra.mxu2 %v374_v12  ;;  %v373_v14 = vld [vmem:[%s560_s3 + $0x18] sm:$0xff]  ;;  %v388_v17 = vld [vmem:[%s559_s2] ss:$0 sm:$0xff] }
 0x11e   :  { %v125_v37 = vmax.f32 %v123_v21, %v124_v29  ;;  %v185_v38 = vrot.slane %v184_v30, 2  ;;  %v233_v39 = vmax.f32 %v231_v26, %v232_v31  ;;  %v198_v40 = vpop.permute.xlu1 %197  ;;  %v244_v41 = vsel %vm242_vm4, %v139_v28, %v132_v24  ;;  %311 = vmatpush.msra.mxu1 %v286_v15 }
 0x11f   :  { %v219_v42 = vmax.f32 %v217_v27, %v218_v34  ;;  %v207_v43 = vadd.f32 %v198_v40, %v505_v36  ;;  %v173_v44 = vrot.slane %v172_v33, 1  ;;  %343 = vmatpush.msra.mxu2 %v373_v14 }
 0x120   :  { %v186_v47 = vmax.f32 %v184_v30, %v185_v38  ;;  %v234_v48 = vrot.slane %v233_v39, 2  ;;  %v243_v49 = vsel %vm242_vm4, %v125_v37, %v118_v32 }
 0x121   :  { %v220_v50 = vrot.slane %v219_v42, 2  ;;  %v224_v51 = vsel %vm209_vm3, %v207_v43, -inf  ;;  %v174_v53 = vmax.f32 %v172_v33, %v173_v44  ;;  %v389_v33 = vld [vmem:[%s561_s4] ss:$0 sm:$0xff] }
 0x122   :  { %v187_v54 = vrot.slane %v186_v47, 1  ;;  %v225_v55 = vrot.slane %v224_v51, 4  ;;  %v235_v59 = vmax.f32 %v233_v39, %v234_v48 }
 0x123   :  { %v221_v56 = vmax.f32 %v219_v42, %v220_v50  ;;  %v251_v57 = vsel %vm242_vm4, %v174_v53, %v167_v52 }
 0x124   :  { %v226_v36 = vmax.f32 %v224_v51, %v225_v55  ;;  %253 = vrot.lane.b32.xlu0 %v251_v57, %s446_s8  ;;  %v188_v61 = vmax.f32 %v186_v47, %v187_v54  ;;  %v236_v4 = vrot.slane %v235_v59, 1 }
 0x125   :  { %v222_v62 = vrot.slane %v221_v56, 1 }
 0x126   :  { %v227_v63 = vrot.slane %v226_v36, 2  ;;  %v252_v0 = vsel %vm242_vm4, %v188_v61, %v181_v60  ;;  %v237_v8 = vmax.f32 %v235_v59, %v236_v4 }
 0x127   :  { %255 = vrot.lane.b32.xlu2 %v252_v0, %s446_s8  ;;  %v223_v2 = vmax.f32 %v221_v56, %v222_v62 }
 0x128   :  { %v228_v3 = vmax.f32 %v226_v36, %v227_v63 }
 0x129   :  { %v263_v5 = vsel %vm242_vm4, %v223_v2, %v216_v1 }
 0x12a   :  { %v229_v6 = vrot.slane %v228_v3, 1  ;;  %265 = vrot.lane.b32.xlu1 %v263_v5, %s447_s9 }
 0x12c   :  { %v230_v7 = vmax.f32 %v228_v3, %v229_v6 }
 0x12e   :  { %v264_v9 = vsel %vm242_vm4, %v237_v8, %v230_v7 }
 0x12f   :  { %267 = vrot.lane.b32.xlu0 %v264_v9, %s447_s9 }
 0x181   :  { %v256_v21 = vpop.permute.xlu2 %255 }
 0x182   :  { %v273_v23 = vsel %vm271_vm6, %v244_v41, %v256_v21 }
 0x196   :  { %v254_v16 = vpop.permute.xlu0 %253 }
 0x197   :  { %v272_v18 = vsel %vm271_vm6, %v243_v49, %v254_v16 }
 0x19c   :  { %v266_v19 = vpop.permute.xlu1 %265 }
 0x19d   :  { %v275_v20 = vsel %vm274_vm5, %v272_v18, %v266_v19 }
 0x19e   :  { %v281_v22 = vadd.f32 %v388_v17, %v275_v20 }
 0x1a0   :  { %v283_v24 = vmax.f32 %v281_v22, 0.0 }
 0x1a1   :  { %v268_v25 = vpop.permute.xlu0 %267 }
 0x1a2   :  { %v276_v26 = vsel %vm274_vm5, %v273_v23, %v268_v25  ;;  %v324_v28 = vrot.slane %v283_v24, 1 }
 0x1a3   :  { %v282_v27 = vadd.f32 %v388_v17, %v276_v26 }
 0x1a5   :  { %v284_v29 = vmax.f32 %v282_v27, 0.0 }
 0x1a7   :  { %v291_v30 = vrot.slane %v284_v29, 7  ;;  %v325_v31 = vsel %vm242_vm4, %v284_v29, %v324_v28 }
 0x1a8   :  { %376 = vmatmul.msk.f32.vlgmr.msra.gmra.mxu2 %vm293_vm7, %v325_v31 }
 0x1a9   :  { %v292_v32 = vsel %vm242_vm4, %v291_v30, %v283_v24 }
 0x1aa   :  { %372 = vmatmul.msk.f32.vlgmr.msra.gmra.mxu1 %vm293_vm7, %v292_v32 }
 0x227   :  { %v313_v34 = vpop.f32.mrf.mxu1 }
 0x228   :  { %v319_v35 = vadd.f32 %v389_v33, %v313_v34 }
 0x22b   :  { %v345_v37 = vpop.f32.mrf.mxu2 }
 0x22c   :  { %v348_v38 = vadd.f32 %v345_v37, %v319_v35 }
 0x22e   :  { %350 = vst.msk [vmem:[#allocation5] sm:$0x3] %vm349_vm8, %v348_v38 }
 0x22f   :  { %361 = dma.vmem_to_hbm [thread:$0]  %s357_s24, 32, %s359_s26, [#allocation4]  }
 0x230   :  { %440 = dma.done.wait [#allocation4], 32  }
 0x231   :  { %441 = vsyncadd [#allocation4], 4294967264 }
 0x232   :  { %366 = vsyncpa [#allocation3], 1 }
 0x233   :  { %367 = vsyncpa [#allocation4], 1 }

</bundles_post_ra>
